<compile_context>
chip_gen: v6e
topology: v6e:2x2x1
jax: 0.10.0
libtpu: 0.0.40
codegen_flags: <defaults>
</compile_context>

<pallas_src>
import functools

import jax
import jax.numpy as jnp
from jax import lax
from jax.experimental import pallas as pl
from jax.experimental.pallas import tpu as pltpu


def _dwconv_kernel(x_ref, wk_ref, bias_ref, o_ref, xcol_ref, *,
                   K, TH, Cin, Cout, H, W, Wo, pad):
    # x_ref   : (1, Cin, H, W)     raw NCHW input block for batch element n
    # wk_ref  : (K, P, Wo*Cout)    fused depthwise(kh) x pointwise weights
    # bias_ref: (1, Wo*Cout)       combined bias, lane q = co*Wo + w
    # o_ref   : (1, Cout, TH, Wo)  NCHW output row tile
    # xcol_ref: (Hp, P)            zero-halo, lane-collapsed image, lane = c*W + w
    h = pl.program_id(1)

    # Build the lane-collapsed, vertically zero-padded image once per batch
    # element; later row tiles (h > 0) of the same n reuse the resident scratch.
    @pl.when(h == 0)
    def _():
        xcol_ref[...] = jnp.zeros_like(xcol_ref)
        for c in range(Cin):
            xcol_ref[pad:pad + H, c * W:(c + 1) * W] = (
                x_ref[0, c, :, :].astype(xcol_ref.dtype))

    row0 = pl.multiple_of(h * TH, TH)

    # Depthwise + pointwise conv as K MXU matmuls: each tap row kh is a direct
    # TH-row load of the scratch times a precomputed fused weight matrix.
    acc = jnp.zeros((TH, Cout * Wo), jnp.float32)
    for kh in range(K):
        rows = xcol_ref[pl.ds(row0 + kh, TH), :]                     # (TH, P)
        acc = acc + jnp.dot(rows, wk_ref[kh],
                            preferred_element_type=jnp.float32)
    acc = acc + bias_ref[...].astype(jnp.float32)                    # (1, L) bcast

    # Lane groups of Wo are the per-output-channel planes -> store NCHW directly.
    for co in range(Cout):
        o_ref[0, co] = acc[:, co * Wo:(co + 1) * Wo].astype(o_ref.dtype)


def depthwise_conv2d(x_nchw, w_dw, b_dw, w_pw, b_pw, *,
                     kernel_size, padding=0, stride=1):
    """Equivalent of DepthWiseConv2d.forward (NCHW in / NCHW out).

    x_nchw: (N, Cin, H, W)
    w_dw  : (Cin, 1, K, K)    depthwise conv weight (groups=Cin)
    b_dw  : (Cin,)
    w_pw  : (Cout, Cin, 1, 1) pointwise conv weight
    b_pw  : (Cout,)
    """
    assert stride == 1  # TODO(synk): stride > 1 depthwise not implemented in-kernel
    N, Cin, H, W = x_nchw.shape
    K = kernel_size
    Cout = w_pw.shape[0]
    pad = padding
    Hp = H + 2 * pad
    Ho = Hp - K + 1
    Wo = W + 2 * pad - K + 1

    P = ((Cin * W + 127) // 128) * 128       # lane-padded collapsed (c, w) axis

    # Row tile: biggest multiple of 8 dividing Ho (capped at 128), else whole image.
    cands = [t for t in range(8, min(Ho, 128) + 1, 8) if Ho % t == 0]
    TH = max(cands) if cands else Ho
    nH = Ho // TH

    # ---- fold depthwise taps + horizontal padding + pointwise 1x1 conv into K
    # ---- matrices W_kh (P, Wo*Cout); tiny one-time prep, fused under jit.
    # W_kh[c*W + u, co*Wo + w] = wd[c, kh, u - w + pad] * wpw[c, co]
    #   (zero when u - w + pad is outside [0, K), i.e. padding columns dropped).
    wd_t = jnp.transpose(w_dw[:, 0, :, :], (1, 2, 0))                # (K, K, Cin)
    wpw_mat = jnp.transpose(w_pw[:, :, 0, 0], (1, 0))                # (Cin, Cout)
    wks = []
    for kh in range(K):
        m = jnp.zeros((Cin * W, Cout * Wo), jnp.float32)
        for kw in range(K):
            a = wd_t[kh, kw][:, None] * wpw_mat                      # (Cin, Cout)
            band = jnp.eye(W, Wo, k=pad - kw, dtype=jnp.float32)     # (W, Wo)
            m = m + jnp.kron(a, band)
        wks.append(jnp.pad(m, ((0, P - Cin * W), (0, 0))))
    wk = jnp.stack(wks, axis=0).astype(jnp.float32)                  # (K, P, Wo*Cout)
    # Depthwise bias folded through the pointwise conv + pointwise bias.
    bias = jnp.repeat(b_dw @ wpw_mat + b_pw, Wo)[None, :].astype(jnp.float32)

    # TODO(synk): W_kh grows ~ K*Cin*Cout*W^2 and the image scratch ~ Hp*Cin*W;
    # for large images tile the lane axes of W_kh / switch to halo row tiles so
    # the resident blocks stay within v7x's 64 MiB VMEM (32 MiB scoped default).
    assert wk.size * 4 <= 8 * 1024 * 1024, wk.shape

    kern = functools.partial(_dwconv_kernel, K=K, TH=TH, Cin=Cin, Cout=Cout,
                             H=H, W=W, Wo=Wo, pad=pad)
    return pl.pallas_call(
        kern,
        out_shape=jax.ShapeDtypeStruct((N, Cout, Ho, Wo), x_nchw.dtype),
        grid_spec=pltpu.PrefetchScalarGridSpec(
            num_scalar_prefetch=0,
            grid=(N, nH),
            in_specs=[
                # Raw NCHW image; index constant over h -> DMA'd once per n.
                pl.BlockSpec((1, Cin, H, W), lambda n, h: (n, 0, 0, 0)),
                # Constant-index fused weights / bias.  NOTE: still
                # double-buffered by the pipeline (~2x their size in VMEM);
                # negligible here -- single-buffer / one-time scratch DMA them
                # if VMEM ever gets tight at scale.
                pl.BlockSpec((K, P, Wo * Cout), lambda n, h: (0, 0, 0)),
                pl.BlockSpec((1, Wo * Cout), lambda n, h: (0, 0)),
            ],
            # NCHW output row tile written directly (no wrapper transpose).
            out_specs=pl.BlockSpec((1, Cout, TH, Wo), lambda n, h: (n, 0, h, 0)),
            scratch_shapes=[pltpu.VMEM((Hp, P), jnp.float32)],
        ),
        compiler_params=pltpu.CompilerParams(
            dimension_semantics=("parallel", "arbitrary"),
            vmem_limit_bytes=32 * 1024 * 1024,
        ),
    )(x_nchw, wk, bias)


def _reference(x, w_dw, b_dw, w_pw, b_pw, padding):
    dn = lax.conv_dimension_numbers(x.shape, w_dw.shape, ("NCHW", "OIHW", "NCHW"))
    y = lax.conv_general_dilated(x, w_dw, (1, 1), [(padding, padding)] * 2,
                                 dimension_numbers=dn,
                                 feature_group_count=x.shape[1])
    y = y + b_dw.reshape(1, -1, 1, 1)
    y = lax.conv_general_dilated(y, w_pw, (1, 1), [(0, 0)] * 2,
                                 dimension_numbers=dn)
    return y + b_pw.reshape(1, -1, 1, 1)


if __name__ == "__main__":
    # Module config: DepthWiseConv2d(dim_in=4, dim_out=8, kernel_size=3, padding=1)
    N, Cin, H, W = 2, 4, 16, 16
    Cout, K, PAD = 8, 3, 1

    key = jax.random.PRNGKey(0)
    kx, k1, k2, k3, k4 = jax.random.split(key, 5)

    x = jax.random.normal(kx, (N, Cin, H, W), dtype=jnp.float32)

    # Deterministic Conv2d-style init (uniform with 1/sqrt(fan_in) bound).
    bound_dw = 1.0 / (1 * K * K) ** 0.5          # depthwise: fan_in = 1*K*K
    w_dw = jax.random.uniform(k1, (Cin, 1, K, K), jnp.float32, -bound_dw, bound_dw)
    b_dw = jax.random.uniform(k2, (Cin,), jnp.float32, -bound_dw, bound_dw)

    bound_pw = 1.0 / (Cin * 1 * 1) ** 0.5        # pointwise: fan_in = Cin
    w_pw = jax.random.uniform(k3, (Cout, Cin, 1, 1), jnp.float32, -bound_pw, bound_pw)
    b_pw = jax.random.uniform(k4, (Cout,), jnp.float32, -bound_pw, bound_pw)

    fwd = jax.jit(functools.partial(depthwise_conv2d,
                                    kernel_size=K, padding=PAD, stride=1))
    out = jax.block_until_ready(fwd(x, w_dw, b_dw, w_pw, b_pw))

    ref = jax.block_until_ready(_reference(x, w_dw, b_dw, w_pw, b_pw, PAD))
    assert out.shape == (N, Cout, H, W), out.shape
    assert jnp.allclose(out, ref, atol=1e-4, rtol=1e-4), \
        float(jnp.max(jnp.abs(out - ref)))

    print("KERNEL_OK")
</pallas_src>

<mosaic_0001>
module attributes {stable_mosaic.version = 11 : i64} {
  func.func @_dwconv_kernel(%arg0: i32, %arg1: i32, %arg2: memref<1x4x16x16xf32, #tpu.memory_space<vmem>>, %arg3: memref<3x128x128xf32, #tpu.memory_space<vmem>>, %arg4: memref<1x128xf32, #tpu.memory_space<vmem>>, %arg5: memref<1x8x16x16xf32, #tpu.memory_space<vmem>>, %arg6: memref<18x128xf32, #tpu.memory_space<vmem>>) attributes {dimension_semantics = [#tpu.dimension_semantics<parallel>, #tpu.dimension_semantics<arbitrary>], iteration_bounds = array<i64: 2, 1>, scalar_prefetch = 0 : i64, scratch_operands = 1 : i64, tpu.core_type = #tpu.core_type<tc>, window_params = [{transform_indices = @transform_0, window_bounds = array<i64: 1, 4, 16, 16>}, {pipeline_mode = #tpu.pipeline_mode<synchronous>, transform_indices = @transform_1, window_bounds = array<i64: 3, 128, 128>}, {pipeline_mode = #tpu.pipeline_mode<synchronous>, transform_indices = @transform_2, window_bounds = array<i64: 1, 128>}, {transform_indices = @transform_3, window_bounds = array<i64: 1, 8, 16, 16>}]} {
    %c0_i32 = arith.constant 0 : i32
    %0 = arith.cmpi eq, %arg1, %c0_i32 : i32
    %1 = arith.extui %0 : i1 to i32
    %c0_i32_0 = arith.constant 0 : i32
    %2 = arith.cmpi ne, %1, %c0_i32_0 : i32
    scf.if %2 {
      %cst_43 = arith.constant 0.000000e+00 : f32
      %62 = vector.broadcast %cst_43 : f32 to vector<18x128xf32>
      %c0_44 = arith.constant 0 : index
      %c0_45 = arith.constant 0 : index
      %63 = vector.load %arg6[%c0_44, %c0_45] : memref<18x128xf32, #tpu.memory_space<vmem>>, vector<18x128xf32>
      tpu.vector_store %arg6[%c0_44, %c0_45], %62 {strides = array<i32>} : memref<18x128xf32, #tpu.memory_space<vmem>>, vector<18x128xf32>,
      %c0_46 = arith.constant 0 : index
      %c0_47 = arith.constant 0 : index
      %c0_48 = arith.constant 0 : index
      %c0_49 = arith.constant 0 : index
      %64 = vector.load %arg2[%c0_46, %c0_47, %c0_48, %c0_49] : memref<1x4x16x16xf32, #tpu.memory_space<vmem>>, vector<1x1x16x16xf32>
      %65 = vector.shape_cast %64 : vector<1x1x16x16xf32> to vector<16x16xf32>
      %c1_50 = arith.constant 1 : index
      %c0_51 = arith.constant 0 : index
      %66 = vector.load %arg6[%c1_50, %c0_51] : memref<18x128xf32, #tpu.memory_space<vmem>>, vector<16x16xf32>
      tpu.vector_store %arg6[%c1_50, %c0_51], %65 {strides = array<i32>} : memref<18x128xf32, #tpu.memory_space<vmem>>, vector<16x16xf32>,
      %c0_52 = arith.constant 0 : index
      %c1_53 = arith.constant 1 : index
      %c0_54 = arith.constant 0 : index
      %c0_55 = arith.constant 0 : index
      %67 = vector.load %arg2[%c0_52, %c1_53, %c0_54, %c0_55] : memref<1x4x16x16xf32, #tpu.memory_space<vmem>>, vector<1x1x16x16xf32>
      %68 = vector.shape_cast %67 : vector<1x1x16x16xf32> to vector<16x16xf32>
      %c1_56 = arith.constant 1 : index
      %c16 = arith.constant 16 : index
      %69 = vector.load %arg6[%c1_56, %c16] : memref<18x128xf32, #tpu.memory_space<vmem>>, vector<16x16xf32>
      tpu.vector_store %arg6[%c1_56, %c16], %68 {strides = array<i32>} : memref<18x128xf32, #tpu.memory_space<vmem>>, vector<16x16xf32>,
      %c0_57 = arith.constant 0 : index
      %c2_58 = arith.constant 2 : index
      %c0_59 = arith.constant 0 : index
      %c0_60 = arith.constant 0 : index
      %70 = vector.load %arg2[%c0_57, %c2_58, %c0_59, %c0_60] : memref<1x4x16x16xf32, #tpu.memory_space<vmem>>, vector<1x1x16x16xf32>
      %71 = vector.shape_cast %70 : vector<1x1x16x16xf32> to vector<16x16xf32>
      %c1_61 = arith.constant 1 : index
      %c32 = arith.constant 32 : index
      %72 = vector.load %arg6[%c1_61, %c32] : memref<18x128xf32, #tpu.memory_space<vmem>>, vector<16x16xf32>
      tpu.vector_store %arg6[%c1_61, %c32], %71 {strides = array<i32>} : memref<18x128xf32, #tpu.memory_space<vmem>>, vector<16x16xf32>,
      %c0_62 = arith.constant 0 : index
      %c3_63 = arith.constant 3 : index
      %c0_64 = arith.constant 0 : index
      %c0_65 = arith.constant 0 : index
      %73 = vector.load %arg2[%c0_62, %c3_63, %c0_64, %c0_65] : memref<1x4x16x16xf32, #tpu.memory_space<vmem>>, vector<1x1x16x16xf32>
      %74 = vector.shape_cast %73 : vector<1x1x16x16xf32> to vector<16x16xf32>
      %c1_66 = arith.constant 1 : index
      %c48 = arith.constant 48 : index
      %75 = vector.load %arg6[%c1_66, %c48] : memref<18x128xf32, #tpu.memory_space<vmem>>, vector<16x16xf32>
      tpu.vector_store %arg6[%c1_66, %c48], %74 {strides = array<i32>} : memref<18x128xf32, #tpu.memory_space<vmem>>, vector<16x16xf32>,
    } else {
    }
    %c16_i32 = arith.constant 16 : i32
    %3 = arith.muli %arg1, %c16_i32 : i32
    %4 = tpu.assume_multiple %3, 16 : i32
    %cst = arith.constant 0.000000e+00 : f32
    %5 = vector.broadcast %cst : f32 to vector<16x128xf32>
    %c0_i32_1 = arith.constant 0 : i32
    %6 = arith.addi %4, %c0_i32_1 : i32
    %7 = arith.index_cast %6 : i32 to index
    %c0 = arith.constant 0 : index
    %8 = vector.load %arg6[%7, %c0] : memref<18x128xf32, #tpu.memory_space<vmem>>, vector<16x128xf32>
    %c0_2 = arith.constant 0 : index
    %c0_3 = arith.constant 0 : index
    %c0_4 = arith.constant 0 : index
    %9 = vector.load %arg3[%c0_2, %c0_3, %c0_4] : memref<3x128x128xf32, #tpu.memory_space<vmem>>, vector<1x128x128xf32>
    %10 = vector.shape_cast %9 : vector<1x128x128xf32> to vector<128x128xf32>
    %cst_5 = arith.constant dense<0.000000e+00> : vector<16x128xf32>
    %11 = tpu.matmul %8, %10, %cst_5 {dimension_numbers = #tpu.dot_dimension_numbers<[1], [0], [0], [1], [0, 0, 1, 1], [], []>} : vector<16x128xf32>, vector<128x128xf32>, vector<16x128xf32> -> vector<16x128xf32>
    %12 = arith.addf %5, %11 : vector<16x128xf32>
    %c1_i32 = arith.constant 1 : i32
    %13 = arith.addi %4, %c1_i32 : i32
    %14 = arith.index_cast %13 : i32 to index
    %c0_6 = arith.constant 0 : index
    %15 = vector.load %arg6[%14, %c0_6] : memref<18x128xf32, #tpu.memory_space<vmem>>, vector<16x128xf32>
    %c1 = arith.constant 1 : index
    %c0_7 = arith.constant 0 : index
    %c0_8 = arith.constant 0 : index
    %16 = vector.load %arg3[%c1, %c0_7, %c0_8] : memref<3x128x128xf32, #tpu.memory_space<vmem>>, vector<1x128x128xf32>
    %17 = vector.shape_cast %16 : vector<1x128x128xf32> to vector<128x128xf32>
    %cst_9 = arith.constant dense<0.000000e+00> : vector<16x128xf32>
    %18 = tpu.matmul %15, %17, %cst_9 {dimension_numbers = #tpu.dot_dimension_numbers<[1], [0], [0], [1], [0, 0, 1, 1], [], []>} : vector<16x128xf32>, vector<128x128xf32>, vector<16x128xf32> -> vector<16x128xf32>
    %19 = arith.addf %12, %18 : vector<16x128xf32>
    %c2_i32 = arith.constant 2 : i32
    %20 = arith.addi %4, %c2_i32 : i32
    %21 = arith.index_cast %20 : i32 to index
    %c0_10 = arith.constant 0 : index
    %22 = vector.load %arg6[%21, %c0_10] : memref<18x128xf32, #tpu.memory_space<vmem>>, vector<16x128xf32>
    %c2 = arith.constant 2 : index
    %c0_11 = arith.constant 0 : index
    %c0_12 = arith.constant 0 : index
    %23 = vector.load %arg3[%c2, %c0_11, %c0_12] : memref<3x128x128xf32, #tpu.memory_space<vmem>>, vector<1x128x128xf32>
    %24 = vector.shape_cast %23 : vector<1x128x128xf32> to vector<128x128xf32>
    %cst_13 = arith.constant dense<0.000000e+00> : vector<16x128xf32>
    %25 = tpu.matmul %22, %24, %cst_13 {dimension_numbers = #tpu.dot_dimension_numbers<[1], [0], [0], [1], [0, 0, 1, 1], [], []>} : vector<16x128xf32>, vector<128x128xf32>, vector<16x128xf32> -> vector<16x128xf32>
    %26 = arith.addf %19, %25 : vector<16x128xf32>
    %c0_14 = arith.constant 0 : index
    %c0_15 = arith.constant 0 : index
    %27 = vector.load %arg4[%c0_14, %c0_15] : memref<1x128xf32, #tpu.memory_space<vmem>>, vector<1x128xf32>
    %28 = vector.broadcast %27 : vector<1x128xf32> to vector<16x128xf32>
    %29 = arith.addf %26, %28 : vector<16x128xf32>
    %30 = vector.extract_strided_slice %29 {offsets = [0, 0], sizes = [16, 16], strides = [1, 1]} : vector<16x128xf32> to vector<16x16xf32>
    %c0_16 = arith.constant 0 : index
    %c0_17 = arith.constant 0 : index
    %c0_18 = arith.constant 0 : index
    %c0_19 = arith.constant 0 : index
    %31 = vector.load %arg5[%c0_16, %c0_17, %c0_18, %c0_19] : memref<1x8x16x16xf32, #tpu.memory_space<vmem>>, vector<1x1x16x16xf32>
    %32 = vector.shape_cast %31 : vector<1x1x16x16xf32> to vector<16x16xf32>
    %33 = vector.shape_cast %30 : vector<16x16xf32> to vector<1x1x16x16xf32>
    tpu.vector_store %arg5[%c0_16, %c0_17, %c0_18, %c0_19], %33 {strides = array<i32>} : memref<1x8x16x16xf32, #tpu.memory_space<vmem>>, vector<1x1x16x16xf32>,
    %34 = vector.extract_strided_slice %29 {offsets = [0, 16], sizes = [16, 16], strides = [1, 1]} : vector<16x128xf32> to vector<16x16xf32>
    %c0_20 = arith.constant 0 : index
    %c1_21 = arith.constant 1 : index
    %c0_22 = arith.constant 0 : index
    %c0_23 = arith.constant 0 : index
    %35 = vector.load %arg5[%c0_20, %c1_21, %c0_22, %c0_23] : memref<1x8x16x16xf32, #tpu.memory_space<vmem>>, vector<1x1x16x16xf32>
    %36 = vector.shape_cast %35 : vector<1x1x16x16xf32> to vector<16x16xf32>
    %37 = vector.shape_cast %34 : vector<16x16xf32> to vector<1x1x16x16xf32>
    tpu.vector_store %arg5[%c0_20, %c1_21, %c0_22, %c0_23], %37 {strides = array<i32>} : memref<1x8x16x16xf32, #tpu.memory_space<vmem>>, vector<1x1x16x16xf32>,
    %38 = vector.extract_strided_slice %29 {offsets = [0, 32], sizes = [16, 16], strides = [1, 1]} : vector<16x128xf32> to vector<16x16xf32>
    %c0_24 = arith.constant 0 : index
    %c2_25 = arith.constant 2 : index
    %c0_26 = arith.constant 0 : index
    %c0_27 = arith.constant 0 : index
    %39 = vector.load %arg5[%c0_24, %c2_25, %c0_26, %c0_27] : memref<1x8x16x16xf32, #tpu.memory_space<vmem>>, vector<1x1x16x16xf32>
    %40 = vector.shape_cast %39 : vector<1x1x16x16xf32> to vector<16x16xf32>
    %41 = vector.shape_cast %38 : vector<16x16xf32> to vector<1x1x16x16xf32>
    tpu.vector_store %arg5[%c0_24, %c2_25, %c0_26, %c0_27], %41 {strides = array<i32>} : memref<1x8x16x16xf32, #tpu.memory_space<vmem>>, vector<1x1x16x16xf32>,
    %42 = vector.extract_strided_slice %29 {offsets = [0, 48], sizes = [16, 16], strides = [1, 1]} : vector<16x128xf32> to vector<16x16xf32>
    %c0_28 = arith.constant 0 : index
    %c3 = arith.constant 3 : index
    %c0_29 = arith.constant 0 : index
    %c0_30 = arith.constant 0 : index
    %43 = vector.load %arg5[%c0_28, %c3, %c0_29, %c0_30] : memref<1x8x16x16xf32, #tpu.memory_space<vmem>>, vector<1x1x16x16xf32>
    %44 = vector.shape_cast %43 : vector<1x1x16x16xf32> to vector<16x16xf32>
    %45 = vector.shape_cast %42 : vector<16x16xf32> to vector<1x1x16x16xf32>
    tpu.vector_store %arg5[%c0_28, %c3, %c0_29, %c0_30], %45 {strides = array<i32>} : memref<1x8x16x16xf32, #tpu.memory_space<vmem>>, vector<1x1x16x16xf32>,
    %46 = vector.extract_strided_slice %29 {offsets = [0, 64], sizes = [16, 16], strides = [1, 1]} : vector<16x128xf32> to vector<16x16xf32>
    %c0_31 = arith.constant 0 : index
    %c4 = arith.constant 4 : index
    %c0_32 = arith.constant 0 : index
    %c0_33 = arith.constant 0 : index
    %47 = vector.load %arg5[%c0_31, %c4, %c0_32, %c0_33] : memref<1x8x16x16xf32, #tpu.memory_space<vmem>>, vector<1x1x16x16xf32>
    %48 = vector.shape_cast %47 : vector<1x1x16x16xf32> to vector<16x16xf32>
    %49 = vector.shape_cast %46 : vector<16x16xf32> to vector<1x1x16x16xf32>
    tpu.vector_store %arg5[%c0_31, %c4, %c0_32, %c0_33], %49 {strides = array<i32>} : memref<1x8x16x16xf32, #tpu.memory_space<vmem>>, vector<1x1x16x16xf32>,
    %50 = vector.extract_strided_slice %29 {offsets = [0, 80], sizes = [16, 16], strides = [1, 1]} : vector<16x128xf32> to vector<16x16xf32>
    %c0_34 = arith.constant 0 : index
    %c5 = arith.constant 5 : index
    %c0_35 = arith.constant 0 : index
    %c0_36 = arith.constant 0 : index
    %51 = vector.load %arg5[%c0_34, %c5, %c0_35, %c0_36] : memref<1x8x16x16xf32, #tpu.memory_space<vmem>>, vector<1x1x16x16xf32>
    %52 = vector.shape_cast %51 : vector<1x1x16x16xf32> to vector<16x16xf32>
    %53 = vector.shape_cast %50 : vector<16x16xf32> to vector<1x1x16x16xf32>
    tpu.vector_store %arg5[%c0_34, %c5, %c0_35, %c0_36], %53 {strides = array<i32>} : memref<1x8x16x16xf32, #tpu.memory_space<vmem>>, vector<1x1x16x16xf32>,
    %54 = vector.extract_strided_slice %29 {offsets = [0, 96], sizes = [16, 16], strides = [1, 1]} : vector<16x128xf32> to vector<16x16xf32>
    %c0_37 = arith.constant 0 : index
    %c6 = arith.constant 6 : index
    %c0_38 = arith.constant 0 : index
    %c0_39 = arith.constant 0 : index
    %55 = vector.load %arg5[%c0_37, %c6, %c0_38, %c0_39] : memref<1x8x16x16xf32, #tpu.memory_space<vmem>>, vector<1x1x16x16xf32>
    %56 = vector.shape_cast %55 : vector<1x1x16x16xf32> to vector<16x16xf32>
    %57 = vector.shape_cast %54 : vector<16x16xf32> to vector<1x1x16x16xf32>
    tpu.vector_store %arg5[%c0_37, %c6, %c0_38, %c0_39], %57 {strides = array<i32>} : memref<1x8x16x16xf32, #tpu.memory_space<vmem>>, vector<1x1x16x16xf32>,
    %58 = vector.extract_strided_slice %29 {offsets = [0, 112], sizes = [16, 16], strides = [1, 1]} : vector<16x128xf32> to vector<16x16xf32>
    %c0_40 = arith.constant 0 : index
    %c7 = arith.constant 7 : index
    %c0_41 = arith.constant 0 : index
    %c0_42 = arith.constant 0 : index
    %59 = vector.load %arg5[%c0_40, %c7, %c0_41, %c0_42] : memref<1x8x16x16xf32, #tpu.memory_space<vmem>>, vector<1x1x16x16xf32>
    %60 = vector.shape_cast %59 : vector<1x1x16x16xf32> to vector<16x16xf32>
    %61 = vector.shape_cast %58 : vector<16x16xf32> to vector<1x1x16x16xf32>
    tpu.vector_store %arg5[%c0_40, %c7, %c0_41, %c0_42], %61 {strides = array<i32>} : memref<1x8x16x16xf32, #tpu.memory_space<vmem>>, vector<1x1x16x16xf32>,
    return
  }
  func.func @transform_0(%arg0: i32, %arg1: i32) -> (i32, i32, i32, i32) {
    %c0_i32 = arith.constant 0 : i32
    %c0_i32_0 = arith.constant 0 : i32
    %c0_i32_1 = arith.constant 0 : i32
    %c0_i32_2 = arith.constant 0 : i32
    return %arg0, %c0_i32, %c0_i32_0, %c0_i32_1 : i32, i32, i32, i32
  }
  func.func @transform_1(%arg0: i32, %arg1: i32) -> (i32, i32, i32) {
    %c0_i32 = arith.constant 0 : i32
    %c0_i32_0 = arith.constant 0 : i32
    %c0_i32_1 = arith.constant 0 : i32
    %c0_i32_2 = arith.constant 0 : i32
    return %c0_i32, %c0_i32_0, %c0_i32_1 : i32, i32, i32
  }
  func.func @transform_2(%arg0: i32, %arg1: i32) -> (i32, i32) {
    %c0_i32 = arith.constant 0 : i32
    %c0_i32_0 = arith.constant 0 : i32
    %c0_i32_1 = arith.constant 0 : i32
    return %c0_i32, %c0_i32_0 : i32, i32
  }
  func.func @transform_3(%arg0: i32, %arg1: i32) -> (i32, i32, i32, i32) {
    %c0_i32 = arith.constant 0 : i32
    %c0_i32_0 = arith.constant 0 : i32
    %c0_i32_1 = arith.constant 0 : i32
    return %arg0, %c0_i32, %arg1, %c0_i32_0 : i32, i32, i32, i32
  }
}

</mosaic_0001>

<bundles_post_ra>
// kernel: depthwise_conv2d.1
= control target key start
LH: loop header
LB: loop body
LE: loop exit
PB: predicated region body
PF: predicated region fallthrough
CT: control target
= control target key end

     0   :  { %8 = vsyncpa [#allocation4], 0  ;;  %s1430_s0 = inlined_call_operand.vmem [shape: f32[2,4,16,16], index: 0, kind: input, shape index: {}]   ;;  %s1431_s1 = inlined_call_operand.vmem [shape: f32[3,128,128], index: 1, kind: input, shape index: {}]   ;;  %s1432_s2 = inlined_call_operand.vmem [shape: f32[1,128], index: 2, kind: input, shape index: {}]   ;;  %s1433_s3 = inlined_call_operand.hbm [shape: f32[2,8,16,16], index: 3, kind: output, shape index: {}]  }
   0x1   :  { %10 = vsyncpa [#allocation4 + $0x1], 0  ;;  %s1106_s12 = smov 0   ;;  %s1108_s13 = smov 0  }
   0x2   :  { %s1110_s14 = smov 0   ;;  %s1112_s15 = smov 0  }
   0x3   :  { %s1114_s16 = smov 0   ;;  %s1116_s17 = smov 0  }
   0x4 LB: > { %s701_s18 = sadd.s32 4294967295, %s1073_s17   ;;  %s702_s19 = sadd.s32 4294967294, %s1073_s17   ;;  %s1073_s17 = sphi %s1116_s17, %s16_s17   ;;  %s1069_s16 = sphi %s1114_s16, %s1440_s16   ;;  %s1065_s15 = sphi %s1112_s15, %s1439_s15   ;;  %s1061_s14 = sphi %s1110_s14, %s1438_s14   ;;  %s1057_s13 = sphi %s1108_s13, %s1437_s13   ;;  %s1053_s12 = sphi %s1106_s12, %s1436_s12  }
   0x5   : > { %s28_s20 = sadd.s32 1, %s1069_s16  ;;  %s105_s21 = sadd.s32 1, %s1061_s14 }
   0x6   : > { %p30_p0 = scmp.ge.s32.totalorder %s28_s20, 2  ;;  %p115_p1 = scmp.ne.s32.totalorder %s1061_s14, %s1057_s13 }
   0x7   : > { %p116_p2 = scmp.eq.s32.totalorder %s701_s18, 1  ;;  %p121_p3 = scmp.ne.s32.totalorder %s1057_s13, %s1053_s12 }
   0x8   : > { %s1442_s20 = smov (%p30_p0, %s28_s20), 0  ;;  %p122_p5 = scmp.eq.s32.totalorder %s702_s19, 1 }
   0x9   : > { %p1146_p4 = por %p116_p2, %p115_p1  ;;  %s100_s23 = ssub.s32 %s1069_s16, %s1442_s20 }
   0xa   : > { %p705_p6 = scmp.ge.s32.totalorder %s1073_s17, 1  ;;  %p103_p7 = scmp.eq.s32.totalorder %s100_s23, 0 }
   0xb   : > { %p1153_p8 = por %p122_p5, %p121_p3  ;;  %p154_p9 = scmp.lt.s32.totalorder %s1073_s17, 3 }
   0xc   : > { %s1159_s25 = scalar_select %p103_p7, %s1061_s14, %s105_s21  }
   0xd   : > { %p155_p10 = pnand %p705_p6, %p154_p9 }
   0xe   : > { %p178_p11 = scmp.lt.s32.totalorder (!%p155_p10), %s1065_s15, 1  ;;  %s1076_s30 = smov (!%p155_p10), 32  }
   0xf   : > { %158 = sbr.rel (%p155_p10) target bundleno = 544 (0x220), region = 32  ;;  %s1077_s4 = smov (!%p155_p10), 16  }
  0x10   : > { %s1078_s28 = smov (!%p155_p10), 48   ;;  %s175_s26 = sand.u32 (!%p155_p10), 1, %s1057_s13  }
  0x11   : > { %s706_s27 = sshll.u32 (!%p155_p10), %s175_s26, 7  ;;  %s1079_s6 = smov (!%p155_p10), 112  }
  0x12   : > { %s1334_s5 = scalar_lea.vmem (!%p155_p10), [#allocation3], %s706_s27  ;;  %s1081_s8 = smov (!%p155_p10), 80  }
  0x13   : > { %s1082_s9 = smov (!%p155_p10), 64   ;;  %s1083_s19 = smov (!%p155_p10), [#allocation3]  }
  0x14   : > { %v732_v0 = vld [vmem:[%s1431_s1 + $0xf8] sm:$0xff]  ;;  %v731_v2 = vld [vmem:[%s1431_s1 + $0xf0] sm:$0xff]  ;;  %v1075_v4 = vmov 0.0   ;;  %s179_s7 = scalar_select %p178_p11, %s1065_s15, 1  ;;  %v730_v5 = vld [vmem:[%s1431_s1 + $0xe8] sm:$0xff]  ;;  %vm193_vm0 = vcmask 130048  }
  0x15   : > { %v257_v1 = vld [vmem:[%s1431_s1 + $0x78] sm:$0xff]  ;;  %827 = vmatprep.subr.mxu0 %v732_v0  ;;  %v256_v3 = vld [vmem:[%s1431_s1 + $0x70] sm:$0xff]  ;;  %188 = vst [vmem:[#allocation2] sm:$0xff] %v1075_v4  ;;  %189 = vst [vmem:[#allocation2 + $0x8] sm:$0xff] %v1075_v4  ;;  %vm207_vm1 = vcmask 261248   ;;  %vm221_vm2 = vcmask 392448  }
  0x16   : > { %862 = vmatprep.subr.mxu1 %v257_v1  ;;  %190 = vst [vmem:[#allocation2 + $0x10] sm:$0x3] %v1075_v4  ;;  %828 = vmatpush3.msra.mxu0 %v732_v0  ;;  %v255_v6 = vld [vmem:[%s1431_s1 + $0x68] sm:$0xff]  ;;  %s771_s18 = sshll.u32 %s179_s7, 6  ;;  %v729_v7 = vld [vmem:[%s1431_s1 + $0xe0] sm:$0xff]  ;;  %v728_v11 = vld [vmem:[%s1431_s1 + $0xd8] sm:$0xff] }
  0x17   : > { %863 = vmatpush3.msra.mxu1 %v257_v1  ;;  %829 = vmatprep.subr.mxu0 %v731_v2  ;;  %s1184_s23 = scalar_lea.vmem %s1430_s0, %s771_s18  ;;  %v254_v8 = vld [vmem:[%s1431_s1 + $0x60] sm:$0xff]  ;;  %v253_v12 = vld [vmem:[%s1431_s1 + $0x58] sm:$0xff]  ;;  %v727_v17 = vld [vmem:[%s1431_s1 + $0xd0] sm:$0xff]  ;;  %vm235_vm3 = vcmask 523648   ;;  %s1080_s7 = smov 96  }
  0x18   : > { %864 = vmatprep.subr.mxu1 %v256_v3  ;;  %830 = vmatpush3.msra.mxu0 %v731_v2  ;;  %v711_v9 = vld [vmem:[%s1184_s23 + $0x20] sm:$0xff]  ;;  %v709_v10 = vld [vmem:[%s1184_s23 + $0x10] sm:$0xff]  ;;  %v712_v13 = vld [vmem:[%s1184_s23 + $0x28] sm:$0xff]  ;;  %s1001_s21 = sshll.u32 %s1083_s19, 4  ;;  %s1002_s21 = int_to_ptr.vmem [resolvable:$false] %s1001_s21 }
  0x19   : > { %865 = vmatpush3.msra.mxu1 %v256_v3  ;;  %831 = vmatprep.subr.mxu0 %v730_v5  ;;  %v710_v14 = vld [vmem:[%s1184_s23 + $0x18] sm:$0xff]  ;;  %v191_v15 = vld [vmem:[%s1184_s23] sm:$0xff]  ;;  %v192_v16 = vld [vmem:[%s1184_s23 + $0x8] sm:$0xff]  ;;  %s1003_s27 = scalar_lea.vmem %s1002_s21, 4096 }
  0x1a   : > { %866 = vmatprep.subr.mxu1 %v255_v6  ;;  %832 = vmatpush3.msra.mxu0 %v730_v5  ;;  %194 = vst.msk [vmem:[#allocation2 + $0x1] sm:$0xff] %vm193_vm0, %v191_v15  ;;  %v252_v18 = vld [vmem:[%s1431_s1 + $0x50] sm:$0xff]  ;;  %195 = vst.msk [vmem:[#allocation2 + $0x9] sm:$0xff] %vm193_vm0, %v192_v16  ;;  %v714_v19 = vld [vmem:[%s1184_s23 + $0x38] sm:$0xff] }
  0x1b   : > { %867 = vmatpush3.msra.mxu1 %v255_v6  ;;  %215 = vrot.lane.b32.xlu1 %v711_v9, %s1076_s30  ;;  %v713_v20 = vld [vmem:[%s1184_s23 + $0x30] sm:$0xff]  ;;  %v726_v21 = vld [vmem:[%s1431_s1 + $0xc8] sm:$0xff]  ;;  %v725_v23 = vld [vmem:[%s1431_s1 + $0xc0] sm:$0xff] }
  0x1c   : > { %201 = vrot.lane.b32.xlu0 %v709_v10, %s1077_s4  ;;  %833 = vmatprep.subr.mxu0 %v729_v7  ;;  %v251_v22 = vld [vmem:[%s1431_s1 + $0x48] sm:$0xff]  ;;  %v250_v24 = vld [vmem:[%s1431_s1 + $0x40] sm:$0xff]  ;;  %v724_v25 = vld [vmem:[%s1431_s1 + $0xb8] sm:$0xff] }
  0x1d   : > { %868 = vmatprep.subr.mxu1 %v254_v8  ;;  %834 = vmatpush3.msra.mxu0 %v729_v7  ;;  %v249_v26 = vld [vmem:[%s1431_s1 + $0x38] sm:$0xff]  ;;  %v723_v27 = vld [vmem:[%s1431_s1 + $0xb0] sm:$0xff]  ;;  %v722_v29 = vld [vmem:[%s1431_s1 + $0xa8] sm:$0xff] }
  0x1e   : > { %869 = vmatpush3.msra.mxu1 %v254_v8  ;;  %835 = vmatprep.subr.mxu0 %v728_v11  ;;  %v248_v28 = vld [vmem:[%s1431_s1 + $0x30] sm:$0xff]  ;;  %v247_v30 = vld [vmem:[%s1431_s1 + $0x28] sm:$0xff]  ;;  %v721_v31 = vld [vmem:[%s1431_s1 + $0xa0] sm:$0xff] }
  0x1f   : > { %870 = vmatprep.subr.mxu1 %v253_v12  ;;  %217 = vrot.lane.b32.xlu1 %v712_v13, %s1076_s30  ;;  %v246_v32 = vld [vmem:[%s1431_s1 + $0x20] sm:$0xff]  ;;  %v720_v33 = vld [vmem:[%s1431_s1 + $0x98] sm:$0xff]  ;;  %v719_v35 = vld [vmem:[%s1431_s1 + $0x90] sm:$0xff] }
  0x20   : > { %203 = vrot.lane.b32.xlu0 %v710_v14, %s1077_s4  ;;  %836 = vmatpush3.msra.mxu0 %v728_v11  ;;  %v245_v34 = vld [vmem:[%s1431_s1 + $0x18] sm:$0xff]  ;;  %v244_v36 = vld [vmem:[%s1431_s1 + $0x10] sm:$0xff]  ;;  %v718_v37 = vld [vmem:[%s1431_s1 + $0x88] sm:$0xff] }
  0x21   : > { %871 = vmatpush3.msra.mxu1 %v253_v12  ;;  %837 = vmatprep.subr.mxu0 %v727_v17  ;;  %v243_v38 = vld [vmem:[%s1431_s1 + $0x8] sm:$0xff]  ;;  %v717_v39 = vld [vmem:[%s1431_s1 + $0x80] sm:$0xff]  ;;  %v750_v41 = vld [vmem:[%s1431_s1 + $0x178] sm:$0xff] }
  0x22   : > { %872 = vmatprep.subr.mxu1 %v252_v18  ;;  %838 = vmatpush3.msra.mxu0 %v727_v17  ;;  %v242_v40 = vld [vmem:[%s1431_s1] sm:$0xff]  ;;  %v749_v52 = vld [vmem:[%s1431_s1 + $0x170] sm:$0xff]  ;;  %v748_v54 = vld [vmem:[%s1431_s1 + $0x168] sm:$0xff] }
  0x23   : > { %873 = vmatpush3.msra.mxu1 %v252_v18  ;;  %231 = vrot.lane.b32.xlu1 %v714_v19, %s1078_s28  ;;  %v747_v55 = vld [vmem:[%s1431_s1 + $0x160] sm:$0xff]  ;;  %v746_v56 = vld [vmem:[%s1431_s1 + $0x158] sm:$0xff]  ;;  %v745_v57 = vld [vmem:[%s1431_s1 + $0x150] sm:$0xff] }
  0x24   : > { %229 = vrot.lane.b32.xlu0 %v713_v20, %s1078_s28  ;;  %839 = vmatprep.subr.mxu0 %v726_v21  ;;  %v744_v58 = vld [vmem:[%s1431_s1 + $0x148] sm:$0xff]  ;;  %v743_v59 = vld [vmem:[%s1431_s1 + $0x140] sm:$0xff]  ;;  %v742_v60 = vld [vmem:[%s1431_s1 + $0x138] sm:$0xff] }
  0x25   : > { %874 = vmatprep.subr.mxu1 %v251_v22  ;;  %840 = vmatpush3.msra.mxu0 %v726_v21  ;;  %v741_v61 = vld [vmem:[%s1431_s1 + $0x130] sm:$0xff]  ;;  %v740_v62 = vld [vmem:[%s1431_s1 + $0x128] sm:$0xff]  ;;  %v739_v63 = vld [vmem:[%s1431_s1 + $0x120] sm:$0xff] }
  0x26   : > { %875 = vmatpush3.msra.mxu1 %v251_v22  ;;  %841 = vmatprep.subr.mxu0 %v725_v23  ;;  %v738_v0 = vld [vmem:[%s1431_s1 + $0x118] sm:$0xff]  ;;  %v737_v1 = vld [vmem:[%s1431_s1 + $0x110] sm:$0xff]  ;;  %v736_v2 = vld [vmem:[%s1431_s1 + $0x108] sm:$0xff] }
  0x27   : > { %876 = vmatprep.subr.mxu1 %v250_v24  ;;  %842 = vmatpush3.msra.mxu0 %v725_v23  ;;  %v735_v3 = vld [vmem:[%s1431_s1 + $0x100] sm:$0xff] }
  0x28   : > { %877 = vmatpush3.msra.mxu1 %v250_v24  ;;  %843 = vmatprep.subr.mxu0 %v724_v25  ;;  %v751_v11 = vld [vmem:[%s1432_s2] ss:$0 sm:$0xff] }
  0x29   : > { %878 = vmatprep.subr.mxu1 %v249_v26  ;;  %844 = vmatpush3.msra.mxu0 %v724_v25 }
  0x2a   : > { %879 = vmatpush3.msra.mxu1 %v249_v26  ;;  %845 = vmatprep.subr.mxu0 %v723_v27 }
  0x2b   : > { %880 = vmatprep.subr.mxu1 %v248_v28  ;;  %846 = vmatpush3.msra.mxu0 %v723_v27 }
  0x2c   : > { %881 = vmatpush3.msra.mxu1 %v248_v28  ;;  %847 = vmatprep.subr.mxu0 %v722_v29 }
  0x2d   : > { %882 = vmatprep.subr.mxu1 %v247_v30  ;;  %848 = vmatpush3.msra.mxu0 %v722_v29 }
  0x2e   : > { %883 = vmatpush3.msra.mxu1 %v247_v30  ;;  %849 = vmatprep.subr.mxu0 %v721_v31 }
  0x2f   : > { %884 = vmatprep.subr.mxu1 %v246_v32  ;;  %850 = vmatpush3.msra.mxu0 %v721_v31 }
  0x30   : > { %885 = vmatpush3.msra.mxu1 %v246_v32  ;;  %851 = vmatprep.subr.mxu0 %v720_v33 }
  0x31   : > { %886 = vmatprep.subr.mxu1 %v245_v34  ;;  %852 = vmatpush3.msra.mxu0 %v720_v33 }
  0x32   : > { %887 = vmatpush3.msra.mxu1 %v245_v34  ;;  %853 = vmatprep.subr.mxu0 %v719_v35 }
  0x33   : > { %888 = vmatprep.subr.mxu1 %v244_v36  ;;  %854 = vmatpush3.msra.mxu0 %v719_v35 }
  0x34   : > { %889 = vmatpush3.msra.mxu1 %v244_v36  ;;  %855 = vmatprep.subr.mxu0 %v718_v37 }
  0x35   : > { %890 = vmatprep.subr.mxu1 %v243_v38  ;;  %856 = vmatpush3.msra.mxu0 %v718_v37 }
  0x36   : > { %891 = vmatpush3.msra.mxu1 %v243_v38  ;;  %857 = vmatprep.subr.mxu0 %v717_v39 }
  0x37   : > { %892 = vmatprep.subr.mxu1 %v242_v40  ;;  %858 = vmatpush3.msra.mxu0 %v717_v39 }
  0x38   : > { %893 = vmatpush3.msra.mxu1 %v242_v40  ;;  %897 = vmatprep.subr.mxu0 %v750_v41 }
  0x8d   : > { %v216_v42 = vpop.permute.xlu1 %215 }
  0x8e   : > { %v202_v43 = vpop.permute.xlu0 %201 }
  0x8f   : > { %208 = vst.msk [vmem:[#allocation2 + $0x1] sm:$0xff] %vm207_vm1, %v202_v43 }
  0x90   : > { %222 = vst.msk [vmem:[#allocation2 + $0x1] sm:$0xff] %vm221_vm2, %v216_v42 }
  0x91   : > { %v218_v44 = vpop.permute.xlu1 %217 }
  0x92   : > { %v204_v45 = vpop.permute.xlu0 %203 }
  0x93   : > { %209 = vst.msk [vmem:[#allocation2 + $0x9] sm:$0xff] %vm207_vm1, %v204_v45 }
  0x94   : > { %223 = vst.msk [vmem:[#allocation2 + $0x9] sm:$0xff] %vm221_vm2, %v218_v44 }
  0x95   : > { %v232_v46 = vpop.permute.xlu1 %231 }
  0x96   : > { %v230_v47 = vpop.permute.xlu0 %229  ;;  %237 = vst.msk [vmem:[#allocation2 + $0x9] sm:$0xff] %vm235_vm3, %v232_v46 }
  0x97   : > { %236 = vst.msk [vmem:[#allocation2 + $0x1] sm:$0xff] %vm235_vm3, %v230_v47 }
  0x9d   : > { %v716_v50 = vld [vmem:[#allocation2 + $0x9] sm:$0xff] }
  0x9e   : > { %v715_v48 = vld [vmem:[#allocation2 + $0x1] sm:$0xff]  ;;  %v734_v4 = vld [vmem:[#allocation2 + $0xa] sm:$0xff] }
  0x9f   : > { %v240_v49 = vld [vmem:[#allocation2] sm:$0xff]  ;;  %859 = vmatprep.mubr.f32.mxu0 %v715_v48  ;;  %v241_v51 = vld [vmem:[#allocation2 + $0x8] sm:$0xff] }
  0xa0   : > { %894 = vmatprep.mubr.f32.mxu1 %v240_v49  ;;  %860 = vmatmul.mubr.f32.vlgmr.msra.gmra.mxu0 %v716_v50  ;;  %v733_v53 = vld [vmem:[#allocation2 + $0x2] sm:$0xff] }
  0xa1   : > { %895 = vmatmul.mubr.f32.vlgmr.msra.gmra.mxu1 %v241_v51  ;;  %898 = vmatpush3.msra.mxu0 %v750_v41 }
  0xa2   : > { %929 = vmatprep.mubr.f32.mxu0 %v733_v53  ;;  %899 = vmatprep.subr.mxu0 %v749_v52 }
  0xa3   : > { %900 = vmatpush3.msra.mxu0 %v749_v52 }
  0xa4   : > { %901 = vmatprep.subr.mxu0 %v748_v54 }
  0xa5   : > { %902 = vmatpush3.msra.mxu0 %v748_v54 }
  0xa6   : > { %903 = vmatprep.subr.mxu0 %v747_v55 }
  0xa7   : > { %904 = vmatpush3.msra.mxu0 %v747_v55 }
  0xa8   : > { %905 = vmatprep.subr.mxu0 %v746_v56 }
  0xa9   : > { %906 = vmatpush3.msra.mxu0 %v746_v56 }
  0xaa   : > { %907 = vmatprep.subr.mxu0 %v745_v57 }
  0xab   : > { %908 = vmatpush3.msra.mxu0 %v745_v57 }
  0xac   : > { %909 = vmatprep.subr.mxu0 %v744_v58 }
  0xad   : > { %910 = vmatpush3.msra.mxu0 %v744_v58 }
  0xae   : > { %911 = vmatprep.subr.mxu0 %v743_v59 }
  0xaf   : > { %912 = vmatpush3.msra.mxu0 %v743_v59 }
  0xb0   : > { %913 = vmatprep.subr.mxu0 %v742_v60 }
  0xb1   : > { %914 = vmatpush3.msra.mxu0 %v742_v60 }
  0xb2   : > { %915 = vmatprep.subr.mxu0 %v741_v61 }
  0xb3   : > { %916 = vmatpush3.msra.mxu0 %v741_v61 }
  0xb4   : > { %917 = vmatprep.subr.mxu0 %v740_v62 }
  0xb5   : > { %918 = vmatpush3.msra.mxu0 %v740_v62 }
  0xb6   : > { %919 = vmatprep.subr.mxu0 %v739_v63 }
  0xb7   : > { %920 = vmatpush3.msra.mxu0 %v739_v63 }
  0xb8   : > { %921 = vmatprep.subr.mxu0 %v738_v0 }
  0xb9   : > { %922 = vmatpush3.msra.mxu0 %v738_v0 }
  0xba   : > { %923 = vmatprep.subr.mxu0 %v737_v1 }
  0xbb   : > { %924 = vmatpush3.msra.mxu0 %v737_v1 }
  0xbc   : > { %925 = vmatprep.subr.mxu0 %v736_v2 }
  0xbd   : > { %926 = vmatpush3.msra.mxu0 %v736_v2 }
  0xbe   : > { %927 = vmatprep.subr.mxu0 %v735_v3 }
  0xbf   : > { %928 = vmatpush3.msra.mxu0 %v735_v3 }
  0xc0   : > { %930 = vmatmul.mubr.f32.vlgmr.msra.gmra.mxu0 %v734_v4 }
 0x160   : > { %v861_v5 = vpop.f32.mrf.mxu0 }
 0x161   : > { %v896_v6 = vpop.f32.mrf.mxu1 }
 0x162   : > { %v345_v7 = vpop.f32.mrf.mxu0  ;;  %v426_v9 = vadd.f32 %v896_v6, %v861_v5 }
 0x163   : > { %v420_v8 = vpop.f32.mrf.mxu1 }
 0x164   : > { %v421_v12 = vadd.f32 %v420_v8, %v345_v7 }
 0x180   : > { %v931_v10 = vpop.f32.mrf.mxu0 }
 0x181   : > { %v526_v13 = vadd.f32 %v931_v10, %v426_v9 }
 0x182   : > { %v516_v14 = vpop.f32.mrf.mxu0 }
 0x183   : > { %v535_v15 = vadd.f32 %v751_v11, %v526_v13  ;;  %v525_v16 = vadd.f32 %v516_v14, %v421_v12 }
 0x185   : > { %538 = vst.msk [vmem:[%s1334_s5 + $0x8] sm:$0xff] %vm193_vm0, %v535_v15  ;;  %v534_v17 = vadd.f32 %v751_v11, %v525_v16  ;;  %543 = vrot.lane.b32.xlu1 %v535_v15, %s1079_s6 }
 0x187   : > { %537 = vst.msk [vmem:[%s1334_s5] sm:$0xff] %vm193_vm0, %v534_v17  ;;  %541 = vrot.lane.b32.xlu0 %v534_v17, %s1079_s6 }
 0x189   : > { %552 = vrot.lane.b32.xlu1 %v535_v15, %s1080_s7 }
 0x18b   : > { %550 = vrot.lane.b32.xlu0 %v534_v17, %s1080_s7 }
 0x18d   : > { %561 = vrot.lane.b32.xlu1 %v535_v15, %s1081_s8 }
 0x18f   : > { %559 = vrot.lane.b32.xlu0 %v534_v17, %s1081_s8 }
 0x191   : > { %570 = vrot.lane.b32.xlu1 %v535_v15, %s1082_s9 }
 0x193   : > { %568 = vrot.lane.b32.xlu0 %v534_v17, %s1082_s9 }
 0x195   : > { %579 = vrot.lane.b32.xlu1 %v535_v15, %s1078_s28 }
 0x197   : > { %577 = vrot.lane.b32.xlu0 %v534_v17, %s1078_s28 }
 0x199   : > { %588 = vrot.lane.b32.xlu1 %v535_v15, %s1076_s30 }
 0x19b   : > { %586 = vrot.lane.b32.xlu0 %v534_v17, %s1076_s30  ;;  %s772_s30 = sshll.u32 %s1065_s15, 11  ;;  %s1385_s15 = scalar_lea.sflag [#allocation4], %s175_s26 }
 0x19c   : > { %s1375_s11 = scalar_lea.hbm %s1433_s3, %s772_s30 }
 0x19d   : > { %597 = vrot.lane.b32.xlu1 %v535_v15, %s1077_s4 }
 0x19f   : > { %595 = vrot.lane.b32.xlu0 %v534_v17, %s1077_s4  ;;  %s620_s4 = sshll.u32 %s1334_s5, 4  ;;  %s1377_s4 = int_to_ptr.vmem [resolvable:$true] %s620_s4 }
 0x1a0   : > { %s997_s18 = scalar_lea.vmem %s1377_s4, 2048  ;;  %p1004_p1 = scmp.lt.s32.totalorder %s1377_s4, %s1002_s21 }
 0x1a1   : > { %p998_p12 = scmp.ne.s32.totalorder %s1377_s4, %s997_s18  ;;  %p1005_p2 = scmp.lt.s32.totalorder %s1003_s27, %s997_s18 }
 0x1a3   : > { %p999_p13 = pnand %p998_p12, %p1146_p4  ;;  %p1006_p3 = por %p1005_p2, %p1004_p1 }
 0x1a5   : > { %p1000_p0 = pneg %p999_p13 }
 0x1a7   : > { %p1007_p5 = pnand %p1006_p3, %p1000_p0 }
 0x1f7   : > { %v544_v18 = vpop.permute.xlu1 %543 }
 0x1f8   : > { %753 = vst.msk [vmem:[%s1334_s5 + $0x18] sm:$0xff] %vm193_vm0, %v544_v18 }
 0x1f9   : > { %v542_v19 = vpop.permute.xlu0 %541 }
 0x1fa   : > { %752 = vst.msk [vmem:[%s1334_s5 + $0x10] sm:$0xff] %vm193_vm0, %v542_v19 }
 0x1fb   : > { %v553_v20 = vpop.permute.xlu1 %552 }
 0x1fc   : > { %755 = vst.msk [vmem:[%s1334_s5 + $0x28] sm:$0xff] %vm193_vm0, %v553_v20 }
 0x1fd   : > { %v551_v21 = vpop.permute.xlu0 %550 }
 0x1fe   : > { %754 = vst.msk [vmem:[%s1334_s5 + $0x20] sm:$0xff] %vm193_vm0, %v551_v21 }
 0x1ff   : > { %v562_v22 = vpop.permute.xlu1 %561 }
 0x200   : > { %757 = vst.msk [vmem:[%s1334_s5 + $0x38] sm:$0xff] %vm193_vm0, %v562_v22 }
 0x201   : > { %v560_v23 = vpop.permute.xlu0 %559 }
 0x202   : > { %756 = vst.msk [vmem:[%s1334_s5 + $0x30] sm:$0xff] %vm193_vm0, %v560_v23 }
 0x203   : > { %v571_v24 = vpop.permute.xlu1 %570 }
 0x204   : > { %759 = vst.msk [vmem:[%s1334_s5 + $0x48] sm:$0xff] %vm193_vm0, %v571_v24 }
 0x205   : > { %v569_v25 = vpop.permute.xlu0 %568 }
 0x206   : > { %758 = vst.msk [vmem:[%s1334_s5 + $0x40] sm:$0xff] %vm193_vm0, %v569_v25 }
 0x207   : > { %v580_v26 = vpop.permute.xlu1 %579 }
 0x208   : > { %761 = vst.msk [vmem:[%s1334_s5 + $0x58] sm:$0xff] %vm193_vm0, %v580_v26 }
 0x209   : > { %v578_v27 = vpop.permute.xlu0 %577 }
 0x20a   : > { %760 = vst.msk [vmem:[%s1334_s5 + $0x50] sm:$0xff] %vm193_vm0, %v578_v27 }
 0x20b   : > { %v589_v28 = vpop.permute.xlu1 %588 }
 0x20c   : > { %763 = vst.msk [vmem:[%s1334_s5 + $0x68] sm:$0xff] %vm193_vm0, %v589_v28 }
 0x20d   : > { %v587_v29 = vpop.permute.xlu0 %586 }
 0x20e   : > { %762 = vst.msk [vmem:[%s1334_s5 + $0x60] sm:$0xff] %vm193_vm0, %v587_v29 }
 0x20f   : > { %v598_v30 = vpop.permute.xlu1 %597 }
 0x210   : > { %765 = vst.msk [vmem:[%s1334_s5 + $0x78] sm:$0xff] %vm193_vm0, %v598_v30 }
 0x211   : > { %v596_v31 = vpop.permute.xlu0 %595 }
 0x212   : > { %764 = vst.msk [vmem:[%s1334_s5 + $0x70] sm:$0xff] %vm193_vm0, %v596_v31 }
 0x213   : > { %1010 = shalt.err (!%p1007_p5)
}
 0x214   : > { %s1011_s26 = scalar_lea.hbm %s1375_s11, 2048  ;;  %s1015_s5 = scalar_lea.hbm %s1433_s3, 4096 }
 0x215   : > { %p1012_p6 = scmp.ne.s32.totalorder %s1375_s11, %s1011_s26  ;;  %p1016_p10 = scmp.lt.s32.totalorder %s1375_s11, %s1433_s3 }
 0x216   : > { %p1017_p11 = scmp.lt.s32.totalorder %s1015_s5, %s1011_s26 }
 0x217   : > { %p1013_p7 = pnand %p1012_p6, %p1146_p4 }
 0x218   : > { %p1018_p12 = por %p1017_p11, %p1016_p10 }
 0x219   : > { %p1014_p9 = pneg %p1013_p7 }
 0x21b   : > { %p1019_p13 = pnand %p1018_p12, %p1014_p9 }
 0x21d   : > { %1022 = shalt.err (!%p1019_p13)
}
 0x21e   : > { %s1084_s8 = smov 128   ;;  %s1085_s9 = smov 8  }
 0x21f   : > { %932 = dma.vmem_to_hbm [thread:$0]  (%p1146_p4), %s1377_s4, 2048, %s1375_s11, %s1385_s15, %s1084_s8, %s1084_s8, %s1085_s9  }
 0x220 PF: > { %p938_p0 = scmp.ge.s32.totalorder %s1073_s17, 2  ;;  %s635_s30 = sand.u32 1, %s1053_s12  }
 0x221   : > { %s636_s28 = scalar_lea.sflag [#allocation4], %s635_s30 }
 0x222   : > { %p935_p1 = pnand %p938_p0, %p1153_p8 }
 0x224   : > { %p936_p2 = pneg %p935_p1 }
 0x226   : > { %1048 = dma.done.wait (%p936_p2), %s636_s28, 2048  }
 0x227   : > { %1050 = vsyncadd (%p936_p2), %s636_s28, 4294965248  ;;  %s16_s17 = sadd.s32 1, %s1073_s17   ;;  %s1436_s12 = smov %s1057_s13 }
 0x228   : > { %p13_p3 = scmp.ge.s32.totalorder %s16_s17, 4   ;;  %s1437_s13 = smov %s1061_s14 }
 0x229   : > { %s1438_s14 = smov %s1159_s25  ;;  %s1439_s15 = smov %s1069_s16 }
 0x22a   : > { %s1440_s16 = smov %s1442_s20  ;;  %15 = sbr.rel (!%p13_p3) target bundleno = 4 (0x4), region = 86 }
 0x22f   :  { %641 = vsyncpa [#allocation4], 1 }
 0x230   :  { %643 = vsyncpa [#allocation4 + $0x1], 1 }

</bundles_post_ra>
